<compile_context>
chip_gen: v5e
topology: v5e:2x2
jax: 0.10.0
libtpu: 0.0.40
codegen_flags: <defaults>
</compile_context>

<pallas_src>
import functools

import jax
import jax.numpy as jnp
from jax.experimental import pallas as pl
from jax.experimental.pallas import tpu as pltpu

_LANE = 512                    # slab width used on the pad path (multiple of 128)
_LANE_CANDIDATES = (2048, 1024, 512, 256, 128)   # tried for the no-pad fast path
_TARGET_TILE_BYTES = 4 << 20   # ~4 MiB per tile buffer (x4 with in/out double buffering)
_VMEM_LIMIT_BYTES = 32 << 20   # explicit scoped-VMEM limit, portable v5e/v6e/v7x


def _svdd_identity_kernel(x_ref, o_ref):
    # TODO(synk): reference forward body is `pass`; there is no arithmetic to
    #             port, so the kernel is an identity tile copy.
    o_ref[...] = x_ref[...]


def _round_up(n: int, m: int) -> int:
    return ((n + m - 1) // m) * m


def _sublane(dtype) -> int:
    # 8 sublanes of 32-bit; sub-32-bit dtypes pack along sublanes.
    return max(8, 32 // jnp.dtype(dtype).itemsize)


def _find_nopad_slab(total: int, sublane: int):
    """Return (rows, lane) for a lane-dense slab needing no padding, or None."""
    for lane in _LANE_CANDIDATES:
        if total % lane == 0:
            rows = total // lane
            if rows > 0 and rows % sublane == 0:
                return rows, lane
    return None


def _pick_tile_m(rows: int, lane: int, sublane: int, itemsize: int) -> int:
    """Tile height: ~4 MiB per buffer, sublane-aligned, >=2 grid steps when possible."""
    tile_m = (_TARGET_TILE_BYTES // (lane * itemsize)) // sublane * sublane
    tile_m = max(sublane, tile_m)
    if tile_m >= rows:
        if rows >= 2 * sublane:
            # Split the single tile in two so the "parallel" grid axis can
            # shard across v7x's two TensorCores (no-op on single-TC v5e/v6e).
            tile_m = _round_up(pl.cdiv(rows, 2), sublane)
        else:
            tile_m = rows
    return tile_m


def _copy_slab(x2d: jax.Array, *, alias_input: bool) -> jax.Array:
    rows, lane = x2d.shape
    sublane = _sublane(x2d.dtype)
    tile_m = _pick_tile_m(rows, lane, sublane, jnp.dtype(x2d.dtype).itemsize)
    grid = (pl.cdiv(rows, tile_m),)   # ragged last block handled by Pallas
    return pl.pallas_call(
        _svdd_identity_kernel,
        out_shape=jax.ShapeDtypeStruct((rows, lane), x2d.dtype),
        grid=grid,
        in_specs=[pl.BlockSpec((tile_m, lane), lambda i: (i, 0))],
        out_specs=pl.BlockSpec((tile_m, lane), lambda i: (i, 0)),
        input_output_aliases=({0: 0} if alias_input else {}),
        compiler_params=pltpu.CompilerParams(
            dimension_semantics=("parallel",),
            vmem_limit_bytes=_VMEM_LIMIT_BYTES,
        ),
    )(x2d)


def _svdd_forward_impl(x: jax.Array, *, donated: bool) -> jax.Array:
    """Pallas equivalent of SVDD.forward: identity pass-through of `x`."""
    orig_shape = x.shape
    total = x.size
    if total == 0:
        return x

    sublane = _sublane(x.dtype)

    # ---- Fast path: lane-dense view with no padding and no trailing slice.
    slab = _find_nopad_slab(total, sublane)
    if slab is not None:
        rows, lane = slab
        x2d = x.reshape(rows, lane)
        # Alias only when the caller's buffer is donated; otherwise XLA would
        # insert a defensive copy and *add* an HBM round trip.
        out2d = _copy_slab(x2d, alias_input=donated)
        return out2d.reshape(orig_shape)

    # ---- Fallback: pad to a (rows, _LANE) slab, copy, strip the padding.
    flat = x.reshape(-1)
    rows = _round_up(pl.cdiv(total, _LANE), sublane)
    padded = rows * _LANE
    flat = jnp.pad(flat, (0, padded - total))
    x2d = flat.reshape(rows, _LANE)
    # Input here is a freshly materialized temporary -> alias is free.
    out2d = _copy_slab(x2d, alias_input=True)
    return out2d.reshape(-1)[:total].reshape(orig_shape)


# Safe default: caller keeps ownership of x (no donation, no forced alias copy).
svdd_forward = jax.jit(functools.partial(_svdd_forward_impl, donated=False))
# Zero-extra-allocation variant for callers that can give up x.
svdd_forward_donated = jax.jit(
    functools.partial(_svdd_forward_impl, donated=True), donate_argnums=0
)


if __name__ == "__main__":
    key = jax.random.PRNGKey(0)

    # Small NCHW input consistent with a conv-style AM input (hits the
    # no-pad fast path: 2*4*16*16 = 2048 = 8 rows x 256 lanes).
    x = jax.random.normal(key, (2, 4, 16, 16), dtype=jnp.float32)
    y = svdd_forward(x)
    jax.block_until_ready(y)
    assert y.shape == x.shape and y.dtype == x.dtype
    assert bool(jnp.allclose(y, x))

    # Also exercise the padded fallback path with an awkward shape.
    x2 = jax.random.normal(key, (3, 5, 7), dtype=jnp.float32)
    y2 = svdd_forward(x2)
    jax.block_until_ready(y2)
    assert y2.shape == x2.shape and bool(jnp.allclose(y2, x2))

    print("KERNEL_OK")
</pallas_src>

<mosaic_0001>
module attributes {stable_mosaic.version = 11 : i64} {
  func.func @_svdd_identity_kernel(%arg0: i32, %arg1: memref<8x256xf32, #tpu.memory_space<vmem>>, %arg2: memref<8x256xf32, #tpu.memory_space<vmem>>) attributes {dimension_semantics = [#tpu.dimension_semantics<parallel>], iteration_bounds = array<i64: 1>, scalar_prefetch = 0 : i64, scratch_operands = 0 : i64, tpu.core_type = #tpu.core_type<tc>, window_params = [{transform_indices = @transform_0, window_bounds = array<i64: 8, 256>}, {transform_indices = @transform_1, window_bounds = array<i64: 8, 256>}]} {
    %c0 = arith.constant 0 : index
    %c0_0 = arith.constant 0 : index
    %0 = vector.load %arg1[%c0, %c0_0] : memref<8x256xf32, #tpu.memory_space<vmem>>, vector<8x256xf32>
    %c0_1 = arith.constant 0 : index
    %c0_2 = arith.constant 0 : index
    %1 = vector.load %arg2[%c0_1, %c0_2] : memref<8x256xf32, #tpu.memory_space<vmem>>, vector<8x256xf32>
    tpu.vector_store %arg2[%c0_1, %c0_2], %0 {strides = array<i32>} : memref<8x256xf32, #tpu.memory_space<vmem>>, vector<8x256xf32>,
    return
  }
  func.func @transform_0(%arg0: i32) -> (i32, i32) {
    %c0_i32 = arith.constant 0 : i32
    %c0_i32_0 = arith.constant 0 : i32
    return %arg0, %c0_i32 : i32, i32
  }
  func.func @transform_1(%arg0: i32) -> (i32, i32) {
    %c0_i32 = arith.constant 0 : i32
    %c0_i32_0 = arith.constant 0 : i32
    return %arg0, %c0_i32 : i32, i32
  }
}

</mosaic_0001>

<bundles_post_ra>
// kernel: _svdd_forward_impl.1
= control target key start
LH: loop header
LB: loop body
LE: loop exit
PB: predicated region body
PF: predicated region fallthrough
CT: control target
= control target key end

     0   :  { %s38_s0 = inlined_call_operand.vmem [shape: f32[8,256], index: 0, kind: input, shape index: {}]   ;;  %s39_s1 = inlined_call_operand.vmem [shape: f32[8,256], index: 1, kind: output, shape index: {}]  }
   0x1   :  { %v8_v0 = vld [vmem:[%s38_s0] sm:$0xff]  ;;  %v9_v1 = vld [vmem:[%s38_s0 + $0x8] sm:$0xff] }
   0x2   :  { %10 = vst [vmem:[%s39_s1] sm:$0xff] %v8_v0 }
   0x3   :  { %11 = vst [vmem:[%s39_s1 + $0x8] sm:$0xff] %v9_v1 }

</bundles_post_ra>
